<compile_context>
chip_gen: v7x
topology: tpu7x:2x2x1
jax: 0.10.0
libtpu: 0.0.40
codegen_flags: <defaults>
</compile_context>

<pallas_src>
import functools
import math

import jax
import jax.numpy as jnp
from jax.experimental import pallas as pl
from jax.experimental.pallas import tpu as pltpu


def _downsample_kernel(band_ref, halo_ref, w_ref, b_ref, o_ref):
    """One (batch, row-block, cout-block) grid step.

    band_ref: (1, tile_ho, Wp, K4)  s2d rows [r*tile_ho, r*tile_ho + tile_ho)
    halo_ref: (1, 1,       Wp, K4)  s2d row  (r+1)*tile_ho  (bottom halo)
    w_ref   : (2, 2, K4, tile_n)    weights per (row shift a, col shift b)
    b_ref   : (1, tile_n)           bias (f32)
    o_ref   : (1, tile_n, tile_m)   channels-major output tile
    """
    tile_ho, wp, k4 = band_ref.shape[1], band_ref.shape[2], band_ref.shape[3]
    wo = wp - 1
    tile_n = o_ref.shape[1]
    tile_m = tile_ho * wo

    # (tile_ho + 1, Wp, K4): concat along the leading (untiled) axis is cheap
    # and stays in the operands' native dtype (no f32 round-trip).
    full = jnp.concatenate([band_ref[0], halo_ref[0]], axis=0)

    acc = jnp.zeros((tile_m, tile_n), jnp.float32)
    for a in (0, 1):              # row shift of the post-s2d 2x2 kernel
        for b in (0, 1):          # column shift
            x = full[a:a + tile_ho, b:b + wo, :].reshape(tile_m, k4)
            acc += jnp.dot(x, w_ref[a, b], preferred_element_type=jnp.float32)

    acc = jnp.maximum(acc + b_ref[...], 0.0)          # bias + ReLU in f32
    # Channels-major store (XLU transpose -> free slot when HBM/MXU bound):
    # NCHW falls out of the kernel with a free reshape in the wrapper.
    o_ref[0] = acc.T.astype(o_ref.dtype)


def _vmem_capacity_bytes():
    """Physical VMEM of the local generation (v7x 64 MiB, v5e/v6e 128 MiB)."""
    try:
        cap = int(pltpu.get_tpu_info().vmem_capacity_bytes)
        if 16 * 2**20 <= cap <= 512 * 2**20:
            return cap
    except Exception:
        pass
    return 64 * 2**20          # conservative (v7x-sized) fallback


def _step_cost(d, wo, k4, tile_n, in_bytes, out_bytes):
    """Rough per-step VMEM footprint for a row block of d output rows."""
    wp = wo + 1
    tm = d * wo
    band = (d + 1) * wp * k4 * in_bytes
    return (3 * band                                   # band (2 bufs) + in-kernel concat copy
            + 2 * tm * k4 * in_bytes                   # tap-operand temporaries
            + 3 * tm * tile_n * 4                      # f32 accumulator + transposed copy
            + 2 * tm * tile_n * out_bytes              # output tile, double-buffered
            + 2 * (4 * k4 * tile_n * in_bytes + tile_n * 4))   # weights + bias


def _pick_tile_n(cp, k4, in_bytes):
    """Full C_out block when weights are small (fetched once); else 128-chunks."""
    if cp % 128 != 0 or 4 * k4 * cp * in_bytes <= 4 * 2**20:
        return cp
    tn = min(cp, 512)
    while cp % tn:
        tn -= 128
    return max(tn, 128)


def _pick_tile_ho(n_other, ho, wo, k4, tile_n, in_bytes, out_bytes, budget):
    """Largest legal row block fitting the VMEM budget (smallest if none fits)."""
    legal = [d for d in range(1, ho + 1)
             if ho % d == 0 and (d == ho or (d * wo) % 128 == 0)]
    # TODO(synk): relax the divisibility / %128 constraint with masked edge
    # blocks instead of occasionally forcing the whole-image row block.
    fit = [d for d in legal if _step_cost(d, wo, k4, tile_n, in_bytes, out_bytes) <= budget]
    if not fit:
        return min(legal)                 # respect VMEM pressure in the fallback
    d = max(fit)
    if n_other * (ho // d) < 4:           # keep both v7x TensorCores busy + pipelined
        deeper = [x for x in fit if n_other * (ho // x) >= 4]
        if deeper:
            d = max(deeper)
    return d


@functools.partial(jax.jit, static_argnames=("compute_dtype",))
def downsample_block(x_nchw, weight_oihw, bias, *, compute_dtype=jnp.float32):
    """Conv2d(C_in, C_out, kernel_size=4, stride=2, padding=1) + ReLU (NCHW)."""
    N, C_in, H, W = x_nchw.shape
    C_out = weight_oihw.shape[0]
    assert weight_oihw.shape[1:] == (C_in, 4, 4)
    assert H % 2 == 0 and W % 2 == 0, "even spatial dims expected"
    # TODO(synk): odd H/W needs an extra bottom/right input row/col; not implemented.

    Ho, Wo = H // 2, W // 2
    Hp, Wp = Ho + 1, Wo + 1            # space-to-depth extents of the padded input
    K4 = 4 * C_in                      # channels after space-to-depth(2)
    out_dtype = x_nchw.dtype

    # ---- glue: pad + space-to-depth(2) straight from NCHW (one fused pass) ----
    x_pad = jnp.pad(x_nchw, ((0, 0), (0, 0), (1, 1), (1, 1)))
    s2d = x_pad.reshape(N, C_in, Hp, 2, Wp, 2)
    s2d = jnp.transpose(s2d, (0, 2, 4, 3, 5, 1)).reshape(N, Hp, Wp, K4)
    s2d = s2d.astype(compute_dtype)

    # weights (O, I, 4, 4) -> w2[a, b, (dr, dc, c), o] with kh = 2a+dr, kw = 2b+dc
    w_t = jnp.transpose(weight_oihw, (2, 3, 1, 0))        # (4, 4, C_in, C_out)
    w_r = w_t.reshape(2, 2, 2, 2, C_in, C_out)            # (a, dr, b, dc, c, o)
    w2 = jnp.transpose(w_r, (0, 2, 1, 3, 4, 5)).reshape(2, 2, K4, C_out)

    # Pad output channels only when C_out is large: lane-dense stores then cost
    # <2x HBM.  Small C_out keeps masked stores with 1x write bytes.
    Cp = C_out if C_out < 128 else 128 * ((C_out + 127) // 128)
    if Cp != C_out:
        w2 = jnp.pad(w2, ((0, 0), (0, 0), (0, 0), (0, Cp - C_out)))
    w2 = w2.astype(compute_dtype)
    b_row = jnp.pad(bias.astype(jnp.float32), (0, Cp - C_out)).reshape(1, Cp)

    in_bytes = jnp.dtype(compute_dtype).itemsize
    out_bytes = jnp.dtype(out_dtype).itemsize

    vmem_cap = _vmem_capacity_bytes()
    budget = vmem_cap // 5                       # ~12.8 MiB v7x, ~25.6 MiB v5e/v6e
    vmem_cap_limit = (vmem_cap * 5) // 8         # ~40 MiB v7x,   ~80 MiB v5e/v6e

    tile_n = _pick_tile_n(Cp, K4, in_bytes)
    n_oc = Cp // tile_n
    tile_ho = _pick_tile_ho(N * n_oc, Ho, Wo, K4, tile_n, in_bytes, out_bytes, budget)
    tile_m = tile_ho * Wo
    n_rb = Ho // tile_ho

    step_bytes = _step_cost(tile_ho, Wo, K4, tile_n, in_bytes, out_bytes)
    vmem_limit = int(min(vmem_cap_limit, max(32 * 2**20, 2 * step_bytes)))

    flops = 2 * N * Ho * Wo * (16 * C_in) * Cp
    w_reads = 1 if n_oc == 1 else N * n_rb * n_oc
    bytes_accessed = int(s2d.size * in_bytes                      # main band, read ~once
                         + N * n_rb * Wp * K4 * in_bytes          # halo rows
                         + w2.size * in_bytes * w_reads
                         + b_row.size * 4
                         + N * Ho * Wo * Cp * out_bytes)

    out = pl.pallas_call(
        _downsample_kernel,
        out_shape=jax.ShapeDtypeStruct((N, Cp, Ho * Wo), out_dtype),
        grid=(N, n_rb, n_oc),
        in_specs=[
            # main band: block index independent of c -> revisited across c
            pl.BlockSpec((1, tile_ho, Wp, K4), lambda n, r, c: (n, r, 0, 0)),
            # bottom halo row of the SAME array (block size 1 => element row)
            pl.BlockSpec((1, 1, Wp, K4),
                         lambda n, r, c: (n, (r + 1) * tile_ho, 0, 0)),
            # weights / bias: constant index map when n_oc == 1 -> DMA'd once
            pl.BlockSpec((2, 2, K4, tile_n), lambda n, r, c: (0, 0, 0, c)),
            pl.BlockSpec((1, tile_n), lambda n, r, c: (0, c)),
        ],
        out_specs=pl.BlockSpec((1, tile_n, tile_m), lambda n, r, c: (n, c, r)),
        compiler_params=pltpu.CompilerParams(
            dimension_semantics=("parallel", "parallel", "parallel"),
            vmem_limit_bytes=vmem_limit,
        ),
        cost_estimate=pl.CostEstimate(
            flops=flops, transcendentals=0, bytes_accessed=bytes_accessed),
    )(s2d, s2d, w2, b_row)

    out = out.reshape(N, Cp, Ho, Wo)               # channels-major: free reshape
    if Cp != C_out:
        out = out[:, :C_out]
    return out


if __name__ == "__main__":
    key = jax.random.PRNGKey(0)
    k_x, k_w, k_b = jax.random.split(key, 3)

    # small shapes consistent with the module: batch=2, in=4, out=8, spatial=16
    N, C_in, C_out, H, W = 2, 4, 8, 16, 16
    x = jax.random.normal(k_x, (N, C_in, H, W), dtype=jnp.float32)
    fan_in = C_in * 4 * 4
    bound = 1.0 / math.sqrt(fan_in)
    weight = jax.random.uniform(k_w, (C_out, C_in, 4, 4), jnp.float32, -bound, bound)
    bias = jax.random.uniform(k_b, (C_out,), jnp.float32, -bound, bound)

    # reference: XLA conv (same semantics as torch Conv2d(k=4,s=2,p=1) + ReLU)
    ref = jax.lax.conv_general_dilated(
        x, weight, window_strides=(2, 2), padding=((1, 1), (1, 1)),
        dimension_numbers=("NCHW", "OIHW", "NCHW"))
    ref = jnp.maximum(ref + bias.reshape(1, -1, 1, 1), 0.0)

    y = jax.block_until_ready(downsample_block(x, weight, bias))
    assert y.shape == (N, C_out, H // 2, W // 2), y.shape
    err = float(jnp.max(jnp.abs(y - ref)))
    assert jnp.allclose(y, ref, atol=1e-4, rtol=1e-4), err

    print("KERNEL_OK")
</pallas_src>

<mosaic_0001>
module attributes {stable_mosaic.version = 11 : i64} {
  func.func @_downsample_kernel(%arg0: i32, %arg1: i32, %arg2: i32, %arg3: memref<1x8x9x16xf32, #tpu.memory_space<vmem>>, %arg4: memref<1x1x9x16xf32, #tpu.memory_space<vmem>>, %arg5: memref<2x2x16x8xf32, #tpu.memory_space<vmem>>, %arg6: memref<1x8xf32, #tpu.memory_space<vmem>>, %arg7: memref<1x8x64xf32, #tpu.memory_space<vmem>>) attributes {dimension_semantics = [#tpu.dimension_semantics<parallel>, #tpu.dimension_semantics<parallel>, #tpu.dimension_semantics<parallel>], iteration_bounds = array<i64: 2, 1, 1>, scalar_prefetch = 0 : i64, scratch_operands = 0 : i64, tpu.core_type = #tpu.core_type<tc>, window_params = [{transform_indices = @transform_0, window_bounds = array<i64: 1, 8, 9, 16>}, {transform_indices = @transform_1, window_bounds = array<i64: 1, 1, 9, 16>}, {transform_indices = @transform_2, window_bounds = array<i64: 2, 2, 16, 8>}, {transform_indices = @transform_3, window_bounds = array<i64: 1, 8>}, {transform_indices = @transform_4, window_bounds = array<i64: 1, 8, 64>}]} {
    %c0 = arith.constant 0 : index
    %c0_0 = arith.constant 0 : index
    %c0_1 = arith.constant 0 : index
    %c0_2 = arith.constant 0 : index
    %0 = vector.load %arg3[%c0, %c0_0, %c0_1, %c0_2] : memref<1x8x9x16xf32, #tpu.memory_space<vmem>>, vector<1x8x9x16xf32>
    %1 = vector.shape_cast %0 : vector<1x8x9x16xf32> to vector<8x9x16xf32>
    %c0_3 = arith.constant 0 : index
    %c0_4 = arith.constant 0 : index
    %c0_5 = arith.constant 0 : index
    %c0_6 = arith.constant 0 : index
    %2 = vector.load %arg4[%c0_3, %c0_4, %c0_5, %c0_6] : memref<1x1x9x16xf32, #tpu.memory_space<vmem>>, vector<1x1x9x16xf32>
    %3 = vector.shape_cast %2 : vector<1x1x9x16xf32> to vector<1x9x16xf32>
    %4 = tpu.concatenate %1, %3 in 0 : vector<8x9x16xf32>, vector<1x9x16xf32> -> vector<9x9x16xf32>
    %cst = arith.constant 0.000000e+00 : f32
    %5 = vector.broadcast %cst : f32 to vector<64x8xf32>
    %6 = vector.extract_strided_slice %4 {offsets = [0, 0, 0], sizes = [8, 8, 16], strides = [1, 1, 1]} : vector<9x9x16xf32> to vector<8x8x16xf32>
    %7 = vector.shape_cast %6 : vector<8x8x16xf32> to vector<64x16xf32>
    %c0_7 = arith.constant 0 : index
    %c0_8 = arith.constant 0 : index
    %c0_9 = arith.constant 0 : index
    %c0_10 = arith.constant 0 : index
    %8 = vector.load %arg5[%c0_7, %c0_8, %c0_9, %c0_10] : memref<2x2x16x8xf32, #tpu.memory_space<vmem>>, vector<1x1x16x8xf32>
    %9 = vector.shape_cast %8 : vector<1x1x16x8xf32> to vector<16x8xf32>
    %cst_11 = arith.constant dense<0.000000e+00> : vector<64x8xf32>
    %10 = tpu.matmul %7, %9, %cst_11 {dimension_numbers = #tpu.dot_dimension_numbers<[1], [0], [0], [1], [0, 0, 1, 1], [], []>} : vector<64x16xf32>, vector<16x8xf32>, vector<64x8xf32> -> vector<64x8xf32>
    %11 = arith.addf %5, %10 : vector<64x8xf32>
    %12 = vector.extract_strided_slice %4 {offsets = [0, 1, 0], sizes = [8, 8, 16], strides = [1, 1, 1]} : vector<9x9x16xf32> to vector<8x8x16xf32>
    %13 = vector.shape_cast %12 : vector<8x8x16xf32> to vector<64x16xf32>
    %c0_12 = arith.constant 0 : index
    %c1 = arith.constant 1 : index
    %c0_13 = arith.constant 0 : index
    %c0_14 = arith.constant 0 : index
    %14 = vector.load %arg5[%c0_12, %c1, %c0_13, %c0_14] : memref<2x2x16x8xf32, #tpu.memory_space<vmem>>, vector<1x1x16x8xf32>
    %15 = vector.shape_cast %14 : vector<1x1x16x8xf32> to vector<16x8xf32>
    %cst_15 = arith.constant dense<0.000000e+00> : vector<64x8xf32>
    %16 = tpu.matmul %13, %15, %cst_15 {dimension_numbers = #tpu.dot_dimension_numbers<[1], [0], [0], [1], [0, 0, 1, 1], [], []>} : vector<64x16xf32>, vector<16x8xf32>, vector<64x8xf32> -> vector<64x8xf32>
    %17 = arith.addf %11, %16 : vector<64x8xf32>
    %18 = vector.extract_strided_slice %4 {offsets = [1, 0, 0], sizes = [8, 8, 16], strides = [1, 1, 1]} : vector<9x9x16xf32> to vector<8x8x16xf32>
    %19 = vector.shape_cast %18 : vector<8x8x16xf32> to vector<64x16xf32>
    %c1_16 = arith.constant 1 : index
    %c0_17 = arith.constant 0 : index
    %c0_18 = arith.constant 0 : index
    %c0_19 = arith.constant 0 : index
    %20 = vector.load %arg5[%c1_16, %c0_17, %c0_18, %c0_19] : memref<2x2x16x8xf32, #tpu.memory_space<vmem>>, vector<1x1x16x8xf32>
    %21 = vector.shape_cast %20 : vector<1x1x16x8xf32> to vector<16x8xf32>
    %cst_20 = arith.constant dense<0.000000e+00> : vector<64x8xf32>
    %22 = tpu.matmul %19, %21, %cst_20 {dimension_numbers = #tpu.dot_dimension_numbers<[1], [0], [0], [1], [0, 0, 1, 1], [], []>} : vector<64x16xf32>, vector<16x8xf32>, vector<64x8xf32> -> vector<64x8xf32>
    %23 = arith.addf %17, %22 : vector<64x8xf32>
    %24 = vector.extract_strided_slice %4 {offsets = [1, 1, 0], sizes = [8, 8, 16], strides = [1, 1, 1]} : vector<9x9x16xf32> to vector<8x8x16xf32>
    %25 = vector.shape_cast %24 : vector<8x8x16xf32> to vector<64x16xf32>
    %c1_21 = arith.constant 1 : index
    %c1_22 = arith.constant 1 : index
    %c0_23 = arith.constant 0 : index
    %c0_24 = arith.constant 0 : index
    %26 = vector.load %arg5[%c1_21, %c1_22, %c0_23, %c0_24] : memref<2x2x16x8xf32, #tpu.memory_space<vmem>>, vector<1x1x16x8xf32>
    %27 = vector.shape_cast %26 : vector<1x1x16x8xf32> to vector<16x8xf32>
    %cst_25 = arith.constant dense<0.000000e+00> : vector<64x8xf32>
    %28 = tpu.matmul %25, %27, %cst_25 {dimension_numbers = #tpu.dot_dimension_numbers<[1], [0], [0], [1], [0, 0, 1, 1], [], []>} : vector<64x16xf32>, vector<16x8xf32>, vector<64x8xf32> -> vector<64x8xf32>
    %29 = arith.addf %23, %28 : vector<64x8xf32>
    %c0_26 = arith.constant 0 : index
    %c0_27 = arith.constant 0 : index
    %30 = vector.load %arg6[%c0_26, %c0_27] : memref<1x8xf32, #tpu.memory_space<vmem>>, vector<1x8xf32>
    %31 = vector.broadcast %30 : vector<1x8xf32> to vector<64x8xf32>
    %32 = arith.addf %29, %31 : vector<64x8xf32>
    %cst_28 = arith.constant 0.000000e+00 : f32
    %33 = vector.broadcast %cst_28 : f32 to vector<64x8xf32>
    %34 = arith.maximumf %32, %33 : vector<64x8xf32>
    %35 = tpu.transpose %34, [1, 0] : vector<64x8xf32> -> vector<8x64xf32>
    %c0_29 = arith.constant 0 : index
    %c0_30 = arith.constant 0 : index
    %c0_31 = arith.constant 0 : index
    %36 = vector.load %arg7[%c0_29, %c0_30, %c0_31] : memref<1x8x64xf32, #tpu.memory_space<vmem>>, vector<1x8x64xf32>
    %37 = vector.shape_cast %36 : vector<1x8x64xf32> to vector<8x64xf32>
    %38 = vector.shape_cast %35 : vector<8x64xf32> to vector<1x8x64xf32>
    tpu.vector_store %arg7[%c0_29, %c0_30, %c0_31], %38 {strides = array<i32>} : memref<1x8x64xf32, #tpu.memory_space<vmem>>, vector<1x8x64xf32>,
    return
  }
  func.func @transform_0(%arg0: i32, %arg1: i32, %arg2: i32) -> (i32, i32, i32, i32) {
    %c0_i32 = arith.constant 0 : i32
    %c0_i32_0 = arith.constant 0 : i32
    %c0_i32_1 = arith.constant 0 : i32
    return %arg0, %arg1, %c0_i32, %c0_i32_0 : i32, i32, i32, i32
  }
  func.func @transform_1(%arg0: i32, %arg1: i32, %arg2: i32) -> (i32, i32, i32, i32) {
    %c1_i32 = arith.constant 1 : i32
    %0 = arith.addi %arg1, %c1_i32 : i32
    %c8_i32 = arith.constant 8 : i32
    %1 = arith.muli %0, %c8_i32 : i32
    %c0_i32 = arith.constant 0 : i32
    %c0_i32_0 = arith.constant 0 : i32
    %c0_i32_1 = arith.constant 0 : i32
    return %arg0, %1, %c0_i32, %c0_i32_0 : i32, i32, i32, i32
  }
  func.func @transform_2(%arg0: i32, %arg1: i32, %arg2: i32) -> (i32, i32, i32, i32) {
    %c0_i32 = arith.constant 0 : i32
    %c0_i32_0 = arith.constant 0 : i32
    %c0_i32_1 = arith.constant 0 : i32
    %c0_i32_2 = arith.constant 0 : i32
    return %c0_i32, %c0_i32_0, %c0_i32_1, %arg2 : i32, i32, i32, i32
  }
  func.func @transform_3(%arg0: i32, %arg1: i32, %arg2: i32) -> (i32, i32) {
    %c0_i32 = arith.constant 0 : i32
    %c0_i32_0 = arith.constant 0 : i32
    return %c0_i32, %arg2 : i32, i32
  }
  func.func @transform_4(%arg0: i32, %arg1: i32, %arg2: i32) -> (i32, i32, i32) {
    %c0_i32 = arith.constant 0 : i32
    return %arg0, %arg2, %arg1 : i32, i32, i32
  }
}

</mosaic_0001>

<bundles_post_ra>
// kernel: downsample_block.1
= control target key start
LH: loop header
LB: loop body
LE: loop exit
PB: predicated region body
PF: predicated region fallthrough
CT: control target
= control target key end

     0   :  { %s1375_s15 = smov 0   ;;  %s1377_s16 = smov 0   ;;  %s1520_s0 = inlined_call_operand.vmem [shape: f32[2,9,9,16], index: 0, kind: input, shape index: {}, may-alias: {0,1}]   ;;  %s1521_s1 = inlined_call_operand.vmem [shape: f32[2,9,9,16], index: 1, kind: input, shape index: {}, may-alias: {0,1}]   ;;  %s1522_s2 = inlined_call_operand.vmem [shape: f32[2,2,16,8], index: 2, kind: input, shape index: {}]   ;;  %s1523_s3 = inlined_call_operand.vmem [shape: f32[1,8], index: 3, kind: input, shape index: {}]   ;;  %s1524_s4 = inlined_call_operand.vmem [shape: f32[2,8,64], index: 4, kind: output, shape index: {}]  }
   0x1   :  { %s1379_s17 = smov 0  }
   0x2 LB: > { %s33_s18 = sadd.s32 1, %s1344_s16  ;;  %p1107_p0 = scmp.ge.s32.totalorder %s1348_s17, 1  ;;  %s1348_s17 = sphi %s1379_s17, %s14_s17   ;;  %s1344_s16 = sphi %s1377_s16, %s1526_s16   ;;  %s1340_s15 = sphi %s1375_s15, %s1525_s15  }
   0x3   : > { %p35_p1 = scmp.ge.s32.totalorder %s33_s18, 2  ;;  %p244_p2 = scmp.lt.s32.totalorder %s1348_s17, 3 }
   0x5   : > { %s1528_s18 = smov (%p35_p1, %s33_s18), 0  ;;  %p245_p3 = pnand %p1107_p0, %p244_p2 }
   0x6   : > { %v1129_v0 = vld [vmem:[%s1522_s2 + $0x20] sm:$0xff] (!%p245_p3)  ;;  %v1130_v1 = vld [vmem:[%s1522_s2 + $0x28] sm:$0xff] (!%p245_p3)  ;;  %v1111_v2 = vld [vmem:[%s1522_s2 + $0x10] sm:$0xff] (!%p245_p3)  ;;  %p309_p4 = scmp.lt.s32.totalorder (!%p245_p3), %s1340_s15, 1  ;;  %vm418_vm0 = vcmask (!%p245_p3), 130048   ;;  %vm390_vm1 = vcmask (!%p245_p3), 1046528  }
   0x7   : > { %248 = sbr.rel (%p245_p3) target bundleno = 389 (0x185), region = 36  ;;  %v1266_v3 = vpack.c.bf16 (!%p245_p3), %v1130_v1, %v1129_v0  ;;  %v1112_v4 = vld [vmem:[%s1522_s2 + $0x18] sm:$0xff] (!%p245_p3)  ;;  %v372_v5 = vld [vmem:[%s1522_s2] sm:$0xff] (!%p245_p3)  ;;  %v373_v6 = vld [vmem:[%s1522_s2 + $0x8] sm:$0xff] (!%p245_p3)  ;;  %vm957_vm2 = vcmask (!%p245_p3), 523264  }
   0x8   : > { %v1258_v7 = vpack.c.bf16 (!%p245_p3), %v1112_v4, %v1111_v2  ;;  %v1262_v8 = vpack.c.bf16 (!%p245_p3), %v373_v6, %v372_v5  ;;  %v1139_v9 = vld [vmem:[%s1522_s2 + $0x30] sm:$0xff] (!%p245_p3)  ;;  %v1140_v10 = vld [vmem:[%s1522_s2 + $0x38] sm:$0xff] (!%p245_p3)  ;;  %v1149_v0 = vld [vmem:[%s1523_s3] ss:$0 sm:$0xff] (!%p245_p3) }
   0x9   : > { %1267 = vmatprep.subr.bf16.mxu0 (!%p245_p3), %v1266_v3  ;;  %v1270_v11 = vpack.c.bf16 (!%p245_p3), %v1140_v10, %v1139_v9 }
   0xa   : > { %1269 = vmatpush3.bf16.msra.mxu0 (!%p245_p3), %v1266_v3  ;;  %1259 = vmatprep.subr.bf16.mxu1 (!%p245_p3), %v1258_v7 }
   0xb   : > { %1261 = vmatpush3.bf16.msra.mxu1 (!%p245_p3), %v1258_v7  ;;  %1271 = vmatprep.subr.bf16.mxu0 (!%p245_p3), %v1270_v11 }
   0xc   : > { %1263 = vmatprep.subr.bf16.mxu1 (!%p245_p3), %v1262_v8 }
   0xe   : > { %s1530_s15 = smov (!%p309_p4, %s1340_s15), 1 }
   0xf   : > { %s1298_s9 = smul.u32 144, %s1530_s15  ;;  %s1110_s23 = sshll.u32 %s1530_s15, 3 }
  0x10   : > { %s353_s26 = scalar_lea.vmem %s1524_s4, %s1110_s23 }
  0x11   : > { %s1425_s12 = scalar_lea.vmem %s1520_s0, %s1298_s9  ;;  %s1153_s13 = sadd.s32 128, %s1298_s9 }
  0x12   : > { %v1428_v12 = vld [vmem:[%s1425_s12 + $0x10] sm:$0xff]  ;;  %v1431_v13 = vld [vmem:[%s1425_s12 + $0x20] sm:$0xff]  ;;  %v355_v16 = vld [vmem:[%s1425_s12 + $0x8] sm:$0x1]  ;;  %s334_s20 = scalar_lea.vmem %s1521_s1, %s1153_s13 }
  0x13   : > { %v354_v14 = vld [vmem:[%s1425_s12] sm:$0xff]  ;;  %v394_v15 = vrot.slane %v1428_v12, 1  ;;  %1230 = vmatprep.mubr.msk.f32.mxu0 %vm418_vm0, %v1428_v12  ;;  %v1439_v18 = vld [vmem:[%s1425_s12 + $0x30] sm:$0xff]  ;;  %v397_v19 = vrot.slane %v1431_v13, 1  ;;  %v392_v20 = vrot.slane %v355_v16, 1 }
  0x14   : > { %v391_v17 = vrot.slane %v354_v14, 1  ;;  %1231 = vmatmul.mubr.msk.f32.vlgmr.msra.gmra.mrb[0].mxu0 %vm418_vm0, %v1431_v13  ;;  %v357_v21 = vld [vmem:[%s1425_s12 + $0x18] sm:$0x1]  ;;  %v400_v22 = vrot.slane %v1439_v18, 1  ;;  %v362_v24 = vld [vmem:[%s1425_s12 + $0x40] sm:$0xff]  ;;  %v364_v31 = vld [vmem:[%s1425_s12 + $0x50] sm:$0xff] }
  0x15   : > { %v395_v23 = vrot.slane %v357_v21, 1  ;;  %1233 = vmatprep.mubr.msk.f32.mxu0 %vm418_vm0, %v1439_v18  ;;  %1273 = vmatpush3.bf16.msra.mxu0 %v1270_v11  ;;  %v359_v25 = vld [vmem:[%s1425_s12 + $0x28] sm:$0x1]  ;;  %v361_v26 = vld [vmem:[%s1425_s12 + $0x38] sm:$0x1]  ;;  %v403_v28 = vrot.slane %v362_v24, 1 }
  0x16   : > { %v393_v27 = vsel %vm390_vm1, %v391_v17, %v392_v20  ;;  %v398_v29 = vrot.slane %v359_v25, 1  ;;  %v401_v30 = vrot.slane %v361_v26, 1  ;;  %v363_v32 = vld [vmem:[%s1425_s12 + $0x48] sm:$0x1]  ;;  %v365_v35 = vld [vmem:[%s1425_s12 + $0x58] sm:$0x1] }
  0x17   : > { %1198 = vmatprep.mubr.msk.f32.mxu1 %vm418_vm0, %v393_v27  ;;  %v396_v33 = vsel %vm390_vm1, %v394_v15, %v395_v23  ;;  %v404_v34 = vrot.slane %v363_v32, 1  ;;  %v367_v37 = vld [vmem:[%s1425_s12 + $0x68] sm:$0x1]  ;;  %v406_v39 = vrot.slane %v364_v31, 1  ;;  %v366_v40 = vld [vmem:[%s1425_s12 + $0x60] sm:$0xff]  ;;  %v407_v41 = vrot.slane %v365_v35, 1 }
  0x18   : > { %1199 = vmatmul.mubr.msk.f32.vlgmr.msra.gmra.mrb[0].mxu1 %vm418_vm0, %v396_v33  ;;  %1234 = vmatmul.mubr.msk.f32.gmra.mrb[2].mxu0 %vm418_vm0, %v362_v24  ;;  %v399_v36 = vsel %vm390_vm1, %v397_v19, %v398_v29  ;;  %v402_v38 = vsel %vm390_vm1, %v400_v22, %v401_v30  ;;  %v409_v42 = vrot.slane %v366_v40, 1  ;;  %v368_v44 = vld [vmem:[%s1425_s12 + $0x70] sm:$0xff]  ;;  %v410_v45 = vrot.slane %v367_v37, 1  ;;  %v369_v46 = vld [vmem:[%s1425_s12 + $0x78] sm:$0x1]  ;;  %v370_v49 = vld [vmem:[%s334_s20] sm:$0xff] }
  0x19   : > { %1265 = vmatpush3.bf16.msra.mxu1 %v1262_v8  ;;  %1201 = vmatprep.mubr.msk.f32.mxu1 %vm418_vm0, %v399_v36  ;;  %v405_v43 = vsel %vm390_vm1, %v403_v28, %v404_v34  ;;  %v408_v47 = vsel %vm390_vm1, %v406_v39, %v407_v41  ;;  %v412_v48 = vrot.slane %v368_v44, 1  ;;  %v413_v50 = vrot.slane %v369_v46, 1  ;;  %v371_v53 = vld [vmem:[%s334_s20 + $0x8] sm:$0x1] }
  0x1a   : > { %1236 = vmatprep.mubr.msk.f32.mxu0 %vm418_vm0, %v364_v31  ;;  %v411_v51 = vsel %vm390_vm1, %v409_v42, %v410_v45  ;;  %v781_v54 = vrot.slane %v370_v49, 1  ;;  %v782_v55 = vrot.slane %v371_v53, 1 }
  0x1b   : > { %v414_v52 = vsel %vm390_vm1, %v412_v48, %v413_v50 }
  0x1c   : > { %1202 = vmatmul.mubr.msk.f32.gmra.mrb[2].mxu1 %vm418_vm0, %v402_v38  ;;  %1237 = vmatmul.mubr.msk.f32.gmra.mrb[4].mxu0 %vm418_vm0, %v366_v40  ;;  %v783_v56 = vsel %vm390_vm1, %v781_v54, %v782_v55 }
  0x1d   : > { %1204 = vmatprep.mubr.msk.f32.mxu1 %vm418_vm0, %v405_v43  ;;  %1239 = vmatprep.mubr.msk.f32.mxu0 %vm418_vm0, %v368_v44 }
  0x20   : > { %1205 = vmatmul.mubr.msk.f32.gmra.mrb[4].mxu1 %vm418_vm0, %v408_v47  ;;  %1240 = vmatmul.mubr.msk.f32.gmra.mrb[6].mxu0 %vm418_vm0, %v370_v49 }
  0x21   : > { %1207 = vmatprep.mubr.msk.f32.mxu1 %vm418_vm0, %v411_v51  ;;  %1246 = vmatprep.mubr.msk.f32.mxu0 %vm418_vm0, %v396_v33 }
  0x24   : > { %1208 = vmatmul.mubr.msk.f32.gmra.mrb[6].mxu1 %vm418_vm0, %v414_v52  ;;  %1247 = vmatmul.mubr.msk.f32.vlgmr.msra.gmra.mrb[0].mxu0 %vm418_vm0, %v399_v36 }
  0x25   : > { %1214 = vmatprep.mubr.msk.f32.mxu1 %vm418_vm0, %v354_v14  ;;  %1249 = vmatprep.mubr.msk.f32.mxu0 %vm418_vm0, %v402_v38 }
  0x28   : > { %1215 = vmatmul.mubr.msk.f32.vlgmr.msra.gmra.mrb[0].mxu1 %vm418_vm0, %v1428_v12  ;;  %1250 = vmatmul.mubr.msk.f32.gmra.mrb[2].mxu0 %vm418_vm0, %v405_v43 }
  0x29   : > { %1217 = vmatprep.mubr.msk.f32.mxu1 %vm418_vm0, %v1431_v13  ;;  %1252 = vmatprep.mubr.msk.f32.mxu0 %vm418_vm0, %v408_v47 }
  0x2c   : > { %1218 = vmatmul.mubr.msk.f32.gmra.mrb[2].mxu1 %vm418_vm0, %v1439_v18  ;;  %1253 = vmatmul.mubr.msk.f32.gmra.mrb[4].mxu0 %vm418_vm0, %v411_v51 }
  0x2d   : > { %1220 = vmatprep.mubr.msk.f32.mxu1 %vm418_vm0, %v362_v24  ;;  %1255 = vmatprep.mubr.msk.f32.mxu0 %vm418_vm0, %v414_v52 }
  0x30   : > { %1221 = vmatmul.mubr.msk.f32.gmra.mrb[4].mxu1 %vm418_vm0, %v364_v31  ;;  %1256 = vmatmul.mubr.msk.f32.gmra.mrb[6].mxu0 %vm418_vm0, %v783_v56 }
  0x31   : > { %1223 = vmatprep.mubr.msk.f32.mxu1 %vm418_vm0, %v366_v40 }
  0x34   : > { %1224 = vmatmul.mubr.msk.f32.gmra.mrb[6].mxu1 %vm418_vm0, %v368_v44 }
  0xf7   : > { %v1248_v57 = vpop.f32.mrb[0].mxu0 }
  0xf8   : > { %v855_v58 = vpop.f32.mrb[1].mxu0 }
  0xfb   : > { %v1216_v59 = vpop.f32.mrb[0].mxu1  ;;  %v1251_v60 = vpop.f32.mrb[2].mxu0 }
  0xfc   : > { %v1274_v61 = vadd.f32 %v1248_v57, %v1216_v59  ;;  %v622_v62 = vpop.f32.mrb[1].mxu1  ;;  %v865_v63 = vpop.f32.mrb[3].mxu0 }
  0xfd   : > { %v1275_v1 = vadd.f32 %v855_v58, %v622_v62 }
  0xfe   : > { %v910_v10 = vadd.f32 %v1274_v61, %v1149_v0 }
  0xff   : > { %v1219_v2 = vpop.f32.mrb[2].mxu1  ;;  %v1254_v3 = vpop.f32.mrb[4].mxu0  ;;  %v909_v4 = vadd.f32 %v1275_v1, %v1149_v0 }
 0x100   : > { %v1276_v5 = vadd.f32 %v1251_v60, %v1219_v2  ;;  %v632_v6 = vpop.f32.mrb[3].mxu1  ;;  %v875_v7 = vpop.f32.mrb[5].mxu0  ;;  %v918_v17 = vmax.f32 %v910_v10, 0.0 }
 0x101   : > { %v1277_v8 = vadd.f32 %v865_v63, %v632_v6  ;;  %v917_v9 = vmax.f32 %v909_v4, 0.0 }
 0x102   : > { %v912_v24 = vadd.f32 %v1276_v5, %v1149_v0 }
 0x103   : > { %925 = vxpose.xlu0.b32.start [1/8] (short) (narrow) %v917_v9, 8  ;;  %v1222_v11 = vpop.f32.mrb[4].mxu1  ;;  %v1257_v12 = vpop.f32.mrb[6].mxu0  ;;  %v911_v18 = vadd.f32 %v1277_v8, %v1149_v0 }
 0x104   : > { %v1278_v13 = vadd.f32 %v1254_v3, %v1222_v11  ;;  %v642_v14 = vpop.f32.mrb[5].mxu1  ;;  %v885_v15 = vpop.f32.mrb[7].mxu0  ;;  %v920_v25 = vmax.f32 %v912_v24, 0.0 }
 0x105   : > { %v1279_v16 = vadd.f32 %v875_v7, %v642_v14  ;;  %v919_v23 = vmax.f32 %v911_v18, 0.0 }
 0x106   : > { %v914_v28 = vadd.f32 %v1278_v13, %v1149_v0 }
 0x107   : > { %926 = vxpose.xlu0.b32.cont [2/8] (short) (narrow) %v918_v17, 8  ;;  %v1225_v19 = vpop.f32.mrb[6].mxu1  ;;  %v913_v26 = vadd.f32 %v1279_v16, %v1149_v0 }
 0x108   : > { %v1280_v20 = vadd.f32 %v1257_v12, %v1225_v19  ;;  %v652_v21 = vpop.f32.mrb[7].mxu1  ;;  %v922_v29 = vmax.f32 %v914_v28, 0.0 }
 0x109   : > { %v1281_v22 = vadd.f32 %v885_v15, %v652_v21  ;;  %v921_v27 = vmax.f32 %v913_v26, 0.0 }
 0x10a   : > { %v916_v32 = vadd.f32 %v1280_v20, %v1149_v0 }
 0x10b   : > { %927 = vxpose.xlu0.b32.cont [3/8] (short) (narrow) %v919_v23, 8  ;;  %v915_v30 = vadd.f32 %v1281_v22, %v1149_v0 }
 0x10c   : > { %v924_v33 = vmax.f32 %v916_v32, 0.0 }
 0x10d   : > { %v923_v31 = vmax.f32 %v915_v30, 0.0 }
 0x10f   : > { %928 = vxpose.xlu0.b32.cont [4/8] (short) (narrow) %v920_v25, 8 }
 0x113   : > { %929 = vxpose.xlu0.b32.cont [5/8] (short) (narrow) %v921_v27, 8 }
 0x117   : > { %930 = vxpose.xlu0.b32.cont [6/8] (short) (narrow) %v922_v29, 8 }
 0x11b   : > { %931 = vxpose.xlu0.b32.cont [7/8] (short) (narrow) %v923_v31, 8 }
 0x11f   : > { %932 = vxpose.xlu0.b32.end [8/8] (short) (narrow) %v924_v33, 8 }
 0x183   : > { %v941_v34 = vpop.trf.xlu0 }
 0x184   : > { %958 = vst.msk [vmem:[%s353_s26] sm:$0xff] %vm957_vm2, %v941_v34 }
 0x185 PF: > { %s14_s17 = sadd.s32 1, %s1348_s17   ;;  %s1525_s15 = smov %s1344_s16 }
 0x186   : > { %p11_p5 = scmp.ge.s32.totalorder %s14_s17, 4   ;;  %s1526_s16 = smov %s1528_s18 }
 0x188   :  { %13 = sbr.rel (!%p11_p5) target bundleno = 2 (0x2), region = 78 }

</bundles_post_ra>
